<compile_context>
chip_gen: v6e
topology: v6e:2x2x1
jax: 0.10.0
libtpu: 0.0.40
codegen_flags: <defaults>
</compile_context>

<pallas_src>
import functools

import jax
import jax.numpy as jnp
from jax.experimental import pallas as pl
from jax.experimental.pallas import tpu as pltpu


def _round_up(x, m):
    return ((x + m - 1) // m) * m


# ---------------------------------------------------------------------------
# Linear projection kernel:  out = x @ W + b   (row-tiled over tokens)
# ---------------------------------------------------------------------------
def _linear_kernel(x_ref, w_ref, b_ref, o_ref):
    # x_ref: (tm, Din), w_ref: (Din, Dout), b_ref: (1, Dout), o_ref: (tm, Dout)
    x = x_ref[...]
    acc = jnp.dot(x, w_ref[...], preferred_element_type=jnp.float32)
    acc = acc + b_ref[...].astype(jnp.float32)
    o_ref[...] = acc.astype(o_ref.dtype)


def _linear(x2d, w, b, *, tm=256):
    """x2d: [M, Din]; w: [Din, Dout]; b: [Dout] -> [M, Dout]."""
    M, Din = x2d.shape
    Dout = w.shape[1]

    # Large, MXU-friendly row tile; pad M (no divisibility assert).
    tm = min(tm, _round_up(M, 8))
    Mp = _round_up(M, tm)
    if Mp != M:
        x2d = jnp.pad(x2d, ((0, Mp - M), (0, 0)))
    b2d = b.reshape(1, Dout)

    nbytes = jnp.dtype(x2d.dtype).itemsize
    vmem_needed = (
        2 * (tm * Din + tm * Dout) * nbytes      # double-buffered x / out tiles
        + 2 * (Din * Dout + Dout) * nbytes       # resident weights (worst case 2 bufs)
        + tm * Dout * 4                          # f32 accumulator
    )
    vmem_limit = min(max(int(vmem_needed * 2), 16 << 20), 48 << 20)

    out = pl.pallas_call(
        _linear_kernel,
        out_shape=jax.ShapeDtypeStruct((Mp, Dout), x2d.dtype),
        grid_spec=pltpu.PrefetchScalarGridSpec(
            num_scalar_prefetch=0,
            grid=(Mp // tm,),
            in_specs=[
                pl.BlockSpec((tm, Din), lambda i: (i, 0)),    # x row tile
                pl.BlockSpec((Din, Dout), lambda i: (0, 0)),  # W (resident)
                pl.BlockSpec((1, Dout), lambda i: (0, 0)),    # b (resident)
            ],
            out_specs=pl.BlockSpec((tm, Dout), lambda i: (i, 0)),
        ),
        compiler_params=pltpu.CompilerParams(
            dimension_semantics=("parallel",),
            vmem_limit_bytes=vmem_limit,
        ),
        cost_estimate=pl.CostEstimate(
            flops=2 * Mp * Din * Dout,
            transcendentals=0,
            bytes_accessed=(Mp * Din + Din * Dout + Dout + Mp * Dout) * nbytes,
        ),
    )(x2d, w, b2d)
    return out[:M] if Mp != M else out


# ---------------------------------------------------------------------------
# Attention core kernel: per (batch, head, q-tile)
#   scores = q @ k^T / scale + mask ; probs = softmax(scores) ; ctx = probs @ v
# ---------------------------------------------------------------------------
def _attn_kernel(q_ref, k_ref, v_ref, m_ref, ctx_ref, probs_ref, *, scale_inv):
    q = q_ref[...]                 # (tq, D)
    k = k_ref[...]                 # (Sk, D)
    v = v_ref[...]                 # (Sk, D)
    bias = m_ref[...].astype(jnp.float32)   # (tq, Sk) additive mask

    # q @ k^T via dot_general (contract last dims) -> f32 scores.
    s = jax.lax.dot_general(
        q, k, (((1,), (1,)), ((), ())), preferred_element_type=jnp.float32)
    s = s * scale_inv + bias

    s_max = jnp.max(s, axis=-1, keepdims=True)
    e = jnp.exp(s - s_max)
    denom = jnp.sum(e, axis=-1, keepdims=True)
    p = e / denom

    probs_ref[...] = p.astype(probs_ref.dtype)
    ctx = jnp.dot(p.astype(v.dtype), v, preferred_element_type=jnp.float32)
    ctx_ref[...] = ctx.astype(ctx_ref.dtype)


def _attention(q4, k4, v4, mask, *, scale, tq=256):
    """q4/k4/v4: [B, H, S, D]; mask: [B, 1, Sq, Sk] additive -> (ctx, probs)."""
    B, H, Sq, D = q4.shape
    Sk = k4.shape[2]

    tq = min(tq, _round_up(Sq, 8))
    Sqp = _round_up(Sq, tq)
    if Sqp != Sq:
        q4 = jnp.pad(q4, ((0, 0), (0, 0), (0, Sqp - Sq), (0, 0)))
        mask = jnp.pad(mask, ((0, 0), (0, 0), (0, Sqp - Sq), (0, 0)))

    nbytes = jnp.dtype(q4.dtype).itemsize
    vmem_needed = (
        2 * (tq * D + 2 * Sk * D + tq * Sk) * nbytes   # inputs, double-buffered
        + 2 * (tq * D + tq * Sk) * nbytes              # outputs, double-buffered
        + 2 * tq * Sk * 4                              # f32 scores / probs temporaries
    )
    vmem_limit = min(max(int(vmem_needed * 2), 16 << 20), 48 << 20)

    kernel = functools.partial(_attn_kernel, scale_inv=1.0 / scale)
    ctx, probs = pl.pallas_call(
        kernel,
        out_shape=(
            jax.ShapeDtypeStruct((B, H, Sqp, D), q4.dtype),
            jax.ShapeDtypeStruct((B, H, Sqp, Sk), q4.dtype),
        ),
        grid_spec=pltpu.PrefetchScalarGridSpec(
            num_scalar_prefetch=0,
            grid=(B, H, Sqp // tq),
            in_specs=[
                pl.BlockSpec((None, None, tq, D), lambda b, h, i: (b, h, i, 0)),   # q tile
                pl.BlockSpec((None, None, Sk, D), lambda b, h, i: (b, h, 0, 0)),   # k (full)
                pl.BlockSpec((None, None, Sk, D), lambda b, h, i: (b, h, 0, 0)),   # v (full)
                pl.BlockSpec((None, None, tq, Sk), lambda b, h, i: (b, 0, i, 0)),  # mask (head-bcast)
            ],
            out_specs=[
                pl.BlockSpec((None, None, tq, D), lambda b, h, i: (b, h, i, 0)),   # ctx
                pl.BlockSpec((None, None, tq, Sk), lambda b, h, i: (b, h, i, 0)),  # probs
            ],
        ),
        compiler_params=pltpu.CompilerParams(
            dimension_semantics=("parallel", "parallel", "parallel"),
            vmem_limit_bytes=vmem_limit,
        ),
        cost_estimate=pl.CostEstimate(
            flops=4 * B * H * Sqp * Sk * D,
            transcendentals=B * H * Sqp * Sk,
            bytes_accessed=(B * H * (2 * Sqp * D + 2 * Sk * D + Sqp * Sk)
                            + B * Sqp * Sk) * nbytes,
        ),
    )(q4, k4, v4, mask)

    if Sqp != Sq:
        ctx = ctx[:, :, :Sq]
        probs = probs[:, :, :Sq]
    return ctx, probs


# ---------------------------------------------------------------------------
# Full module forward
# ---------------------------------------------------------------------------
def multi_head_attention(q, k, v, mask, wq, bq, wk, bk, wv, bv, wo, bo,
                         *, n_head, d_head):
    """q/k/v: [B, S, d_model]; mask: [B, 1, Sq, Sk] additive.
    Weights are [in, out] (transpose of PyTorch nn.Linear). Returns (x, attn_probs)."""
    B, Sq, Dm = q.shape
    Sk = k.shape[1]
    scale = float(d_head) ** 0.5

    qp = _linear(q.reshape(B * Sq, Dm), wq, bq).reshape(B, Sq, n_head, d_head)
    kp = _linear(k.reshape(B * Sk, Dm), wk, bk).reshape(B, Sk, n_head, d_head)
    vp = _linear(v.reshape(B * Sk, Dm), wv, bv).reshape(B, Sk, n_head, d_head)

    q4 = jnp.transpose(qp, (0, 2, 1, 3))   # (B, H, Sq, D)
    k4 = jnp.transpose(kp, (0, 2, 1, 3))
    v4 = jnp.transpose(vp, (0, 2, 1, 3))

    ctx, attn = _attention(q4, k4, v4, mask.astype(q.dtype), scale=scale)

    x = jnp.transpose(ctx, (0, 2, 1, 3)).reshape(B, Sq, n_head * d_head)
    out = _linear(x.reshape(B * Sq, n_head * d_head), wo, bo).reshape(B, Sq, Dm)
    # TODO(synk): droplayer/dropattn are identity in eval mode; skipped here.
    return out, attn


# ---------------------------------------------------------------------------
# Pure-JAX reference
# ---------------------------------------------------------------------------
def _ref_mha(q, k, v, mask, wq, bq, wk, bk, wv, bv, wo, bo, *, n_head, d_head):
    B, Sq, Dm = q.shape
    Sk = k.shape[1]
    scale = float(d_head) ** 0.5
    hi = jax.lax.Precision.HIGHEST

    def proj(x, w, b):
        return jnp.einsum("bsd,de->bse", x, w, precision=hi) + b

    qp = proj(q, wq, bq).reshape(B, Sq, n_head, d_head).transpose(0, 2, 1, 3)
    kp = proj(k, wk, bk).reshape(B, Sk, n_head, d_head).transpose(0, 2, 1, 3)
    vp = proj(v, wv, bv).reshape(B, Sk, n_head, d_head).transpose(0, 2, 1, 3)

    s = jnp.einsum("bhqd,bhkd->bhqk", qp, kp, precision=hi) / scale + mask
    p = jax.nn.softmax(s, axis=-1)
    ctx = jnp.einsum("bhqk,bhkd->bhqd", p, vp, precision=hi)
    x = ctx.transpose(0, 2, 1, 3).reshape(B, Sq, n_head * d_head)
    out = jnp.einsum("bsd,de->bse", x, wo, precision=hi) + bo
    return out, p


if __name__ == "__main__":
    B, S, d_model, n_head, d_head = 2, 8, 32, 4, 8
    d_io = n_head * d_head

    key = jax.random.PRNGKey(0)
    ks = jax.random.split(key, 12)

    def init_w(kk, din, dout):
        bound = 1.0 / (din ** 0.5)
        return jax.random.uniform(kk, (din, dout), jnp.float32, -bound, bound)

    def init_b(kk, din, dout):
        bound = 1.0 / (din ** 0.5)
        return jax.random.uniform(kk, (dout,), jnp.float32, -bound, bound)

    wq, bq = init_w(ks[0], d_model, d_io), init_b(ks[1], d_model, d_io)
    wk, bk = init_w(ks[2], d_model, d_io), init_b(ks[3], d_model, d_io)
    wv, bv = init_w(ks[4], d_model, d_io), init_b(ks[5], d_model, d_io)
    wo, bo = init_w(ks[6], d_io, d_model), init_b(ks[7], d_io, d_model)

    q = jax.random.normal(ks[8], (B, S, d_model), jnp.float32)
    k = jax.random.normal(ks[9], (B, S, d_model), jnp.float32)
    v = jax.random.normal(ks[10], (B, S, d_model), jnp.float32)

    # Additive key-padding mask: batch 0 sees all 8 keys, batch 1 only the first 6.
    kv_len = jnp.array([S, 6])
    visible = jnp.arange(S)[None, :] < kv_len[:, None]            # (B, Sk)
    mask = jnp.where(visible, 0.0, -1e9)[:, None, None, :]        # (B, 1, 1, Sk)
    mask = jnp.broadcast_to(mask, (B, 1, S, S)).astype(jnp.float32)

    out, attn = multi_head_attention(q, k, v, mask, wq, bq, wk, bk, wv, bv, wo, bo,
                                     n_head=n_head, d_head=d_head)
    out = jax.block_until_ready(out)
    attn = jax.block_until_ready(attn)

    ref_out, ref_attn = _ref_mha(q, k, v, mask, wq, bq, wk, bk, wv, bv, wo, bo,
                                 n_head=n_head, d_head=d_head)

    assert out.shape == (B, S, d_model)
    assert attn.shape == (B, n_head, S, S)
    assert jnp.allclose(out, ref_out, atol=1e-4, rtol=1e-4)
    assert jnp.allclose(attn, ref_attn, atol=1e-4, rtol=1e-4)

    print("KERNEL_OK")
</pallas_src>

<mosaic_0001>
module attributes {stable_mosaic.version = 11 : i64} {
  func.func @_linear_kernel(%arg0: i32, %arg1: memref<16x32xf32, #tpu.memory_space<vmem>>, %arg2: memref<32x32xf32, #tpu.memory_space<vmem>>, %arg3: memref<1x32xf32, #tpu.memory_space<vmem>>, %arg4: memref<16x32xf32, #tpu.memory_space<vmem>>) attributes {dimension_semantics = [#tpu.dimension_semantics<parallel>], iteration_bounds = array<i64: 1>, scalar_prefetch = 0 : i64, scratch_operands = 0 : i64, tpu.core_type = #tpu.core_type<tc>, window_params = [{transform_indices = @transform_0, window_bounds = array<i64: 16, 32>}, {pipeline_mode = #tpu.pipeline_mode<synchronous>, transform_indices = @transform_1, window_bounds = array<i64: 32, 32>}, {pipeline_mode = #tpu.pipeline_mode<synchronous>, transform_indices = @transform_2, window_bounds = array<i64: 1, 32>}, {transform_indices = @transform_3, window_bounds = array<i64: 16, 32>}]} {
    %c0 = arith.constant 0 : index
    %c0_0 = arith.constant 0 : index
    %0 = vector.load %arg1[%c0, %c0_0] : memref<16x32xf32, #tpu.memory_space<vmem>>, vector<16x32xf32>
    %c0_1 = arith.constant 0 : index
    %c0_2 = arith.constant 0 : index
    %1 = vector.load %arg2[%c0_1, %c0_2] : memref<32x32xf32, #tpu.memory_space<vmem>>, vector<32x32xf32>
    %cst = arith.constant dense<0.000000e+00> : vector<16x32xf32>
    %2 = tpu.matmul %0, %1, %cst {dimension_numbers = #tpu.dot_dimension_numbers<[1], [0], [0], [1], [0, 0, 1, 1], [], []>} : vector<16x32xf32>, vector<32x32xf32>, vector<16x32xf32> -> vector<16x32xf32>
    %c0_3 = arith.constant 0 : index
    %c0_4 = arith.constant 0 : index
    %3 = vector.load %arg3[%c0_3, %c0_4] : memref<1x32xf32, #tpu.memory_space<vmem>>, vector<1x32xf32>
    %4 = vector.broadcast %3 : vector<1x32xf32> to vector<16x32xf32>
    %5 = arith.addf %2, %4 : vector<16x32xf32>
    %c0_5 = arith.constant 0 : index
    %c0_6 = arith.constant 0 : index
    %6 = vector.load %arg4[%c0_5, %c0_6] : memref<16x32xf32, #tpu.memory_space<vmem>>, vector<16x32xf32>
    tpu.vector_store %arg4[%c0_5, %c0_6], %5 {strides = array<i32>} : memref<16x32xf32, #tpu.memory_space<vmem>>, vector<16x32xf32>,
    return
  }
  func.func @transform_0(%arg0: i32) -> (i32, i32) {
    %c0_i32 = arith.constant 0 : i32
    %c0_i32_0 = arith.constant 0 : i32
    return %arg0, %c0_i32 : i32, i32
  }
  func.func @transform_1(%arg0: i32) -> (i32, i32) {
    %c0_i32 = arith.constant 0 : i32
    %c0_i32_0 = arith.constant 0 : i32
    %c0_i32_1 = arith.constant 0 : i32
    return %c0_i32, %c0_i32_0 : i32, i32
  }
  func.func @transform_2(%arg0: i32) -> (i32, i32) {
    %c0_i32 = arith.constant 0 : i32
    %c0_i32_0 = arith.constant 0 : i32
    %c0_i32_1 = arith.constant 0 : i32
    return %c0_i32, %c0_i32_0 : i32, i32
  }
  func.func @transform_3(%arg0: i32) -> (i32, i32) {
    %c0_i32 = arith.constant 0 : i32
    %c0_i32_0 = arith.constant 0 : i32
    return %arg0, %c0_i32 : i32, i32
  }
}

</mosaic_0001>

<bundles_post_ra>
// kernel: tpu_custom_call.1
= control target key start
LH: loop header
LB: loop body
LE: loop exit
PB: predicated region body
PF: predicated region fallthrough
CT: control target
= control target key end

     0   :  { %8 = vsyncpa [#allocation3], 0  ;;  %s299_s0 = inlined_call_operand.hbm [shape: f32[16,32], index: 0, kind: input, shape index: {}]   ;;  %s300_s1 = inlined_call_operand.hbm [shape: f32[32,32], index: 1, kind: input, shape index: {}]   ;;  %s301_s2 = inlined_call_operand.vmem [shape: f32[1,32], index: 2, kind: input, shape index: {}]   ;;  %s302_s3 = inlined_call_operand.hbm [shape: f32[16,32], index: 3, kind: output, shape index: {}]  }
   0x1   :  { %9 = vsyncpa [#allocation6], 0 }
   0x2   :  { %10 = vsyncpa [#allocation4], 0  ;;  %s249_s12 = smov [#allocation2]  }
   0x3   :  { %s16_s13 = sshll.u32 %s249_s12, 4  ;;  %s17_s13 = int_to_ptr.vmem [resolvable:$true] %s16_s13 }
   0x4   :  { %s191_s14 = scalar_lea.vmem %s17_s13, 256  ;;  %p196_p1 = scmp.lt.s32.totalorder %s17_s13, %s17_s13 }
   0x5   :  { %p192_p0 = scmp.ne.s32.totalorder %s17_s13, %s191_s14  ;;  %p197_p2 = scmp.lt.s32.totalorder %s191_s14, %s191_s14 }
   0x7   :  { %p198_p3 = por %p197_p2, %p196_p1 }
   0x9   :  { %p199_p4 = pnand %p198_p3, %p192_p0 }
   0xb   :  { %202 = shalt.err (!%p199_p4)
}
   0xc   :  { %s250_s15 = smov 128   ;;  %s251_s16 = smov 8  }
   0xd   :  { %22 = dma.hbm_to_vmem [thread:$0]  %s299_s0, 256, %s17_s13, [#allocation3], %s250_s15, %s250_s15, %s251_s16  }
   0xe   :  { %s252_s19 = smov [#allocation5]  }
   0xf   :  { %s28_s20 = sshll.u32 %s252_s19, 4  ;;  %s29_s20 = int_to_ptr.vmem [resolvable:$true] %s28_s20 }
  0x10   :  { %s211_s21 = scalar_lea.vmem %s29_s20, 512  ;;  %p216_p6 = scmp.lt.s32.totalorder %s29_s20, %s29_s20 }
  0x11   :  { %p212_p5 = scmp.ne.s32.totalorder %s29_s20, %s211_s21  ;;  %p217_p7 = scmp.lt.s32.totalorder %s211_s21, %s211_s21 }
  0x13   :  { %p218_p8 = por %p217_p7, %p216_p6 }
  0x15   :  { %p219_p9 = pnand %p218_p8, %p212_p5 }
  0x17   :  { %222 = shalt.err (!%p219_p9)
}
  0x18   :  { %34 = dma.hbm_to_vmem [thread:$0]  %s300_s1, 512, %s29_s20, [#allocation6], %s250_s15, %s250_s15, %s251_s16  }
  0x19   :  { %243 = dma.done.wait [#allocation3], 256  }
  0x1a   :  { %244 = vsyncadd [#allocation3], 4294967040 }
  0x1b   :  { %245 = dma.done.wait [#allocation6], 512  }
  0x1c   :  { %246 = vsyncadd [#allocation6], 4294966784  ;;  %vm56_vm0 = vcmask 261120   ;;  %v48_v0 = vld [vmem:[#allocation5 + $0x18] sm:$0xff]  ;;  %v47_v1 = vld [vmem:[#allocation5 + $0x10] sm:$0xff]  ;;  %s253_s24 = smov [#allocation7]  }
  0x1d   :  { %167 = vmatprep.subr.mxu0 %v48_v0  ;;  %v43_v2 = vld [vmem:[#allocation2] sm:$0xff]  ;;  %v46_v3 = vld [vmem:[#allocation5 + $0x8] sm:$0xff]  ;;  %v45_v4 = vld [vmem:[#allocation5] sm:$0xff]  ;;  %s145_s25 = sshll.u32 %s253_s24, 4  ;;  %s146_s25 = int_to_ptr.vmem [resolvable:$true] %s145_s25 }
  0x1e   :  { %168 = vmatpush3.msra.mxu0 %v48_v0  ;;  %175 = vmatprep.mubr.msk.f32.mxu0 %vm56_vm0, %v43_v2  ;;  %v44_v5 = vld [vmem:[#allocation2 + $0x8] sm:$0xff]  ;;  %v158_v6 = vld [vmem:[%s301_s2] ss:$0 sm:$0xff]  ;;  %s223_s26 = scalar_lea.vmem %s146_s25, 256  ;;  %p228_p11 = scmp.lt.s32.totalorder %s146_s25, %s146_s25 }
  0x1f   :  { %169 = vmatprep.subr.mxu0 %v47_v1  ;;  %p224_p10 = scmp.ne.s32.totalorder %s146_s25, %s223_s26  ;;  %p229_p12 = scmp.lt.s32.totalorder %s223_s26, %s223_s26 }
  0x20   :  { %170 = vmatpush3.msra.mxu0 %v47_v1 }
  0x21   :  { %171 = vmatprep.subr.mxu0 %v46_v3  ;;  %p230_p13 = por %p229_p12, %p228_p11 }
  0x22   :  { %172 = vmatpush3.msra.mxu0 %v46_v3 }
  0x23   :  { %173 = vmatprep.subr.mxu0 %v45_v4  ;;  %p231_p0 = pnand %p230_p13, %p224_p10 }
  0x24   :  { %174 = vmatpush3.msra.mxu0 %v45_v4 }
  0x25   :  { %176 = vmatmul.mubr.msk.f32.vlgmr.msra.gmra.mxu0 %vm56_vm0, %v44_v5 }
  0xe5   :  { %v177_v7 = vpop.f32.mrf.mxu0 }
  0xe6   :  { %v135_v8 = vadd.f32 %v177_v7, %v158_v6 }
  0xe7   :  { %v129_v9 = vpop.f32.mrf.mxu0 }
  0xe8   :  { %139 = vst.msk [vmem:[#allocation7 + $0x8] sm:$0xff] %vm56_vm0, %v135_v8  ;;  %v130_v10 = vadd.f32 %v158_v6, %v129_v9 }
  0xea   :  { %138 = vst.msk [vmem:[#allocation7] sm:$0xff] %vm56_vm0, %v130_v10 }
  0xeb   :  { %234 = shalt.err (!%p231_p0)
}
  0xec   :  { %151 = dma.vmem_to_hbm [thread:$0]  %s146_s25, 256, %s302_s3, [#allocation4], %s250_s15, %s250_s15, %s251_s16  }
  0xed   :  { %247 = dma.done.wait [#allocation4], 256  }
  0xee   :  { %248 = vsyncadd [#allocation4], 4294967040 }
  0xef   :  { %155 = vsyncpa [#allocation3], 1 }
  0xf0   :  { %156 = vsyncpa [#allocation6], 1 }
  0xf1   :  { %157 = vsyncpa [#allocation4], 1 }

</bundles_post_ra>
